<compile_context>
chip_gen: v7x
topology: tpu7x:2x2x1
jax: 0.10.0
libtpu: 0.0.40
codegen_flags: <defaults>
</compile_context>

<pallas_src>
import functools

import jax
import jax.numpy as jnp
from jax import lax
from jax.experimental import pallas as pl
from jax.experimental.pallas import tpu as pltpu


def _round_up(v, m):
    return (v + m - 1) // m * m


def _lr_cnn_kernel(x_ref, wt_ref, cb_ref, lwt_ref, lb_ref, o_ref, *, K, L_out):
    # x_ref  : (B_TILE, L_x, C_pad)   bf16, one batch tile (time padded by K-1)
    # wt_ref : (K*C_pad, H_pad)       bf16, im2col conv weight (tap-major rows)
    # cb_ref : (1, H_pad)             f32 conv bias
    # lwt_ref: (H_pad, NL_pad)        f32 linear weight (transposed, zero-padded)
    # lb_ref : (1, NL_pad)            f32 linear bias
    # o_ref  : (B_TILE, NL_pad)       f32 logits (lane-dense)
    B_t, L_x, C_pad = x_ref.shape
    H_pad = wt_ref.shape[1]
    L_w = L_x - (K - 1)                 # padded number of conv output positions

    x = x_ref[...]                                              # (B_t, L_x, C_pad)

    # im2col along lanes (tap-major, matches wt row order k*C_pad + c).
    x_unf = jnp.concatenate([x[:, k:k + L_w, :] for k in range(K)], axis=-1)
    x2 = x_unf.reshape(B_t * L_w, K * C_pad)                    # clean collapse (L_w % 8 == 0)

    # Single MXU matmul for the whole conv, f32 accumulation.
    s = jnp.dot(x2, wt_ref[...], preferred_element_type=jnp.float32)  # (B_t*L_w, H_pad)
    s = s + cb_ref[...]                                          # bias broadcast
    c = jnp.maximum(s, 0.0)                                      # ReLU
    c = c.reshape(B_t, L_w, H_pad)

    # Mask padded time positions (t >= L_out). ReLU output >= 0, so 0 is neutral
    # for the max and exactly matches torch's max-pool over the valid window.
    t_idx = lax.broadcasted_iota(jnp.int32, (B_t, L_w, H_pad), 1)
    c = jnp.where(t_idx < L_out, c, 0.0)

    feat = jnp.max(c, axis=1)                                    # (B_t, H_pad) f32

    logits = jnp.dot(feat, lwt_ref[...],
                     preferred_element_type=jnp.float32) + lb_ref[...]
    o_ref[...] = logits.astype(o_ref.dtype)


def lr_cnn_forward(arg1, conn, arg2, glove, conv_w, conv_b, lin_w, lin_b,
                   *, b_tile=32):
    """arg1/conn/arg2: int32 (B, L) token ids. Returns logits (B, num_labels)."""
    B, L = arg1.shape
    V, E = glove.shape
    H, C_in, K = conv_w.shape            # torch Conv1d weight: (out, in, K)
    NL = lin_w.shape[0]
    assert C_in == 3 * E
    L_out = L - K + 1
    assert L_out >= 1

    # Padded / tiled sizes (lane = 128, sublane = 8).
    C_pad = _round_up(C_in, 128)
    H_pad = _round_up(H, 128)
    NL_pad = _round_up(NL, 128)
    L_w = _round_up(L_out, 8)            # conv output positions computed per element
    L_x = L_w + K - 1                    # time rows needed in the input block

    # Batch tile: multiple of 8 (sublane-dense output); tune per generation
    # (smaller on v7x's 64 MiB VMEM). Grid length >= 2 feeds both v7x TCs.
    B_tile = min(b_tile, _round_up(B, 8))
    B_pad = _round_up(B, B_tile)

    # --- glue in plain JAX: one fused embedding gather + pad + bf16 cast ---
    ids = jnp.stack([arg1, conn, arg2], axis=2)          # (B, L, 3)
    x = jnp.take(glove, ids, axis=0).reshape(B, L, 3 * E)  # channel order: [e1|ec|e2]
    x = jnp.pad(x, ((0, B_pad - B), (0, L_x - L), (0, C_pad - C_in)))
    x = x.astype(jnp.bfloat16)                            # bf16 in, f32 accumulate

    # Conv weight -> im2col layout: (H, C_in, K) -> (K, C_pad, H_pad) -> (K*C_pad, H_pad)
    wt = jnp.zeros((K, C_pad, H_pad), jnp.float32)
    wt = wt.at[:, :C_in, :H].set(jnp.transpose(conv_w, (2, 1, 0)))
    wt = wt.reshape(K * C_pad, H_pad).astype(jnp.bfloat16)
    cb = jnp.zeros((1, H_pad), jnp.float32).at[0, :H].set(conv_b)

    # Linear head stays f32 (tiny), zero-padded to lane-dense shapes.
    lwt = jnp.zeros((H_pad, NL_pad), jnp.float32).at[:H, :NL].set(lin_w.T)
    lb = jnp.zeros((1, NL_pad), jnp.float32).at[0, :NL].set(lin_b)

    grid = (B_pad // B_tile,)
    kernel = functools.partial(_lr_cnn_kernel, K=K, L_out=L_out)

    flops = 2 * B_pad * L_w * (K * C_pad) * H_pad + 2 * B_pad * H_pad * NL_pad
    bytes_accessed = (x.size * 2 + wt.size * 2 + cb.size * 4
                      + lwt.size * 4 + lb.size * 4 + B_pad * NL_pad * 4)

    out = pl.pallas_call(
        kernel,
        out_shape=jax.ShapeDtypeStruct((B_pad, NL_pad), jnp.float32),
        grid_spec=pltpu.PrefetchScalarGridSpec(
            num_scalar_prefetch=0,
            grid=grid,
            in_specs=[
                pl.BlockSpec((B_tile, L_x, C_pad), lambda b: (b, 0, 0)),
                pl.BlockSpec((K * C_pad, H_pad), lambda b: (0, 0)),
                pl.BlockSpec((1, H_pad), lambda b: (0, 0)),
                pl.BlockSpec((H_pad, NL_pad), lambda b: (0, 0)),
                pl.BlockSpec((1, NL_pad), lambda b: (0, 0)),
            ],
            out_specs=pl.BlockSpec((B_tile, NL_pad), lambda b: (b, 0)),
        ),
        compiler_params=pltpu.CompilerParams(
            dimension_semantics=("parallel",),
            vmem_limit_bytes=64 * 1024 * 1024,
        ),
        cost_estimate=pl.CostEstimate(
            flops=flops, transcendentals=0, bytes_accessed=bytes_accessed),
    )(x, wt, cb, lwt, lb)

    return out[:B, :NL]


def _reference_forward(arg1, conn, arg2, glove, conv_w, conv_b, lin_w, lin_b):
    """Pure-JAX f32 reference mirroring the torch module (NCW layout)."""
    def emb_t(ids):
        return jnp.transpose(jnp.take(glove, ids, axis=0), (0, 2, 1))  # (B, E, L)
    x = jnp.concatenate([emb_t(arg1), emb_t(conn), emb_t(arg2)], axis=1)  # (B, 3E, L)
    s1 = lax.conv_general_dilated(
        x, conv_w, window_strides=(1,), padding="VALID",
        dimension_numbers=("NCH", "OIH", "NCH")) + conv_b[None, :, None]
    c = jnp.maximum(s1, 0.0)
    c = jnp.max(c, axis=-1)                        # global max-pool + squeeze
    return c @ lin_w.T + lin_b[None, :]


if __name__ == "__main__":
    # Small, deterministic synthetic config.
    VOCAB, EMB = 50, 16          # GloVe table
    B, L = 2, 8                  # batch, (common) sequence length
    K = 3                        # conv kernel_size
    HIDDEN = 32                  # conv out channels (hidden_size)
    NUM_LABELS = 4
    NUM_FEATURES = 3 * EMB       # conv in_channels = concat of 3 embedded args

    key = jax.random.PRNGKey(0)
    k_glove, k_cw, k_cb, k_lw, k_a1, k_cn, k_a2 = jax.random.split(key, 7)

    glove = jax.random.normal(k_glove, (VOCAB, EMB), jnp.float32)
    # Conv1d default-style init (deterministic synthetic values, not a checkpoint).
    bound = 1.0 / (NUM_FEATURES * K) ** 0.5
    conv_w = jax.random.uniform(k_cw, (HIDDEN, NUM_FEATURES, K), jnp.float32,
                                -bound, bound)
    conv_b = jax.random.uniform(k_cb, (HIDDEN,), jnp.float32, -bound, bound)
    # reset_parameters(): normal(std=0.01) weight, zero bias for the linear head.
    lin_w = 0.01 * jax.random.normal(k_lw, (NUM_LABELS, HIDDEN), jnp.float32)
    lin_b = jnp.zeros((NUM_LABELS,), jnp.float32)

    arg1 = jax.random.randint(k_a1, (B, L), 0, VOCAB, jnp.int32)
    conn = jax.random.randint(k_cn, (B, L), 0, VOCAB, jnp.int32)
    arg2 = jax.random.randint(k_a2, (B, L), 0, VOCAB, jnp.int32)

    logits = lr_cnn_forward(arg1, conn, arg2, glove, conv_w, conv_b, lin_w, lin_b)
    logits = jax.block_until_ready(logits)

    ref = _reference_forward(arg1, conn, arg2, glove, conv_w, conv_b, lin_w, lin_b)
    assert logits.shape == (B, NUM_LABELS)
    # bf16 matmul inputs (f32 accumulate) -> tolerance loosened vs pure-f32 ref.
    assert jnp.allclose(logits, ref, atol=5e-3, rtol=5e-3), "mismatch vs reference"

    print("KERNEL_OK")
</pallas_src>

<mosaic_0001>
module attributes {stable_mosaic.version = 11 : i64} {
  func.func @_lr_cnn_kernel(%arg0: i32, %arg1: memref<8x10x128xbf16, #tpu.memory_space<vmem>>, %arg2: memref<384x128xbf16, #tpu.memory_space<vmem>>, %arg3: memref<1x128xf32, #tpu.memory_space<vmem>>, %arg4: memref<128x128xf32, #tpu.memory_space<vmem>>, %arg5: memref<1x128xf32, #tpu.memory_space<vmem>>, %arg6: memref<8x128xf32, #tpu.memory_space<vmem>>) attributes {dimension_semantics = [#tpu.dimension_semantics<parallel>], iteration_bounds = array<i64: 1>, scalar_prefetch = 0 : i64, scratch_operands = 0 : i64, tpu.core_type = #tpu.core_type<tc>, window_params = [{transform_indices = @transform_0, window_bounds = array<i64: 8, 10, 128>}, {pipeline_mode = #tpu.pipeline_mode<synchronous>, transform_indices = @transform_1, window_bounds = array<i64: 384, 128>}, {pipeline_mode = #tpu.pipeline_mode<synchronous>, transform_indices = @transform_2, window_bounds = array<i64: 1, 128>}, {pipeline_mode = #tpu.pipeline_mode<synchronous>, transform_indices = @transform_3, window_bounds = array<i64: 128, 128>}, {pipeline_mode = #tpu.pipeline_mode<synchronous>, transform_indices = @transform_4, window_bounds = array<i64: 1, 128>}, {transform_indices = @transform_5, window_bounds = array<i64: 8, 128>}]} {
    %c0 = arith.constant 0 : index
    %c0_0 = arith.constant 0 : index
    %c0_1 = arith.constant 0 : index
    %0 = vector.load %arg1[%c0, %c0_0, %c0_1] : memref<8x10x128xbf16, #tpu.memory_space<vmem>>, vector<8x10x128xbf16>
    %1 = vector.extract_strided_slice %0 {offsets = [0, 0, 0], sizes = [8, 8, 128], strides = [1, 1, 1]} : vector<8x10x128xbf16> to vector<8x8x128xbf16>
    %2 = vector.extract_strided_slice %0 {offsets = [0, 1, 0], sizes = [8, 8, 128], strides = [1, 1, 1]} : vector<8x10x128xbf16> to vector<8x8x128xbf16>
    %3 = vector.extract_strided_slice %0 {offsets = [0, 2, 0], sizes = [8, 8, 128], strides = [1, 1, 1]} : vector<8x10x128xbf16> to vector<8x8x128xbf16>
    %4 = tpu.concatenate %1, %2, %3 in 2 : vector<8x8x128xbf16>, vector<8x8x128xbf16>, vector<8x8x128xbf16> -> vector<8x8x384xbf16>
    %5 = vector.shape_cast %4 : vector<8x8x384xbf16> to vector<64x384xbf16>
    %c0_2 = arith.constant 0 : index
    %c0_3 = arith.constant 0 : index
    %6 = vector.load %arg2[%c0_2, %c0_3] : memref<384x128xbf16, #tpu.memory_space<vmem>>, vector<384x128xbf16>
    %cst = arith.constant dense<0.000000e+00> : vector<64x128xf32>
    %7 = tpu.matmul %5, %6, %cst {dimension_numbers = #tpu.dot_dimension_numbers<[1], [0], [0], [1], [0, 0, 1, 1], [], []>} : vector<64x384xbf16>, vector<384x128xbf16>, vector<64x128xf32> -> vector<64x128xf32>
    %c0_4 = arith.constant 0 : index
    %c0_5 = arith.constant 0 : index
    %8 = vector.load %arg3[%c0_4, %c0_5] : memref<1x128xf32, #tpu.memory_space<vmem>>, vector<1x128xf32>
    %9 = vector.broadcast %8 : vector<1x128xf32> to vector<64x128xf32>
    %10 = arith.addf %7, %9 : vector<64x128xf32>
    %cst_6 = arith.constant 0.000000e+00 : f32
    %11 = vector.broadcast %cst_6 : f32 to vector<64x128xf32>
    %12 = arith.maximumf %10, %11 : vector<64x128xf32>
    %13 = vector.shape_cast %12 : vector<64x128xf32> to vector<8x8x128xf32>
    %14 = tpu.iota {dimensions = array<i32: 1>} : vector<8x8x128xi32>
    %c6_i32 = arith.constant 6 : i32
    %15 = vector.broadcast %c6_i32 : i32 to vector<8x8x128xi32>
    %16 = arith.cmpi slt, %14, %15 : vector<8x8x128xi32>
    %cst_7 = arith.constant 0.000000e+00 : f32
    %17 = vector.broadcast %cst_7 : f32 to vector<8x8x128xf32>
    %18 = arith.select %16, %13, %17 : vector<8x8x128xi1>, vector<8x8x128xf32>
    %cst_8 = arith.constant dense<0xFF800000> : vector<8x128xf32>
    %19 = vector.multi_reduction <maximumf>, %18, %cst_8 [1] : vector<8x8x128xf32> to vector<8x128xf32>
    %c0_9 = arith.constant 0 : index
    %c0_10 = arith.constant 0 : index
    %20 = vector.load %arg4[%c0_9, %c0_10] : memref<128x128xf32, #tpu.memory_space<vmem>>, vector<128x128xf32>
    %cst_11 = arith.constant dense<0.000000e+00> : vector<8x128xf32>
    %21 = tpu.matmul %19, %20, %cst_11 {dimension_numbers = #tpu.dot_dimension_numbers<[1], [0], [0], [1], [0, 0, 1, 1], [], []>} : vector<8x128xf32>, vector<128x128xf32>, vector<8x128xf32> -> vector<8x128xf32>
    %c0_12 = arith.constant 0 : index
    %c0_13 = arith.constant 0 : index
    %22 = vector.load %arg5[%c0_12, %c0_13] : memref<1x128xf32, #tpu.memory_space<vmem>>, vector<1x128xf32>
    %23 = vector.broadcast %22 : vector<1x128xf32> to vector<8x128xf32>
    %24 = arith.addf %21, %23 : vector<8x128xf32>
    %c0_14 = arith.constant 0 : index
    %c0_15 = arith.constant 0 : index
    %25 = vector.load %arg6[%c0_14, %c0_15] : memref<8x128xf32, #tpu.memory_space<vmem>>, vector<8x128xf32>
    tpu.vector_store %arg6[%c0_14, %c0_15], %24 {strides = array<i32>} : memref<8x128xf32, #tpu.memory_space<vmem>>, vector<8x128xf32>,
    return
  }
  func.func @transform_0(%arg0: i32) -> (i32, i32, i32) {
    %c0_i32 = arith.constant 0 : i32
    %c0_i32_0 = arith.constant 0 : i32
    %c0_i32_1 = arith.constant 0 : i32
    return %arg0, %c0_i32, %c0_i32_0 : i32, i32, i32
  }
  func.func @transform_1(%arg0: i32) -> (i32, i32) {
    %c0_i32 = arith.constant 0 : i32
    %c0_i32_0 = arith.constant 0 : i32
    %c0_i32_1 = arith.constant 0 : i32
    return %c0_i32, %c0_i32_0 : i32, i32
  }
  func.func @transform_2(%arg0: i32) -> (i32, i32) {
    %c0_i32 = arith.constant 0 : i32
    %c0_i32_0 = arith.constant 0 : i32
    %c0_i32_1 = arith.constant 0 : i32
    return %c0_i32, %c0_i32_0 : i32, i32
  }
  func.func @transform_3(%arg0: i32) -> (i32, i32) {
    %c0_i32 = arith.constant 0 : i32
    %c0_i32_0 = arith.constant 0 : i32
    %c0_i32_1 = arith.constant 0 : i32
    return %c0_i32, %c0_i32_0 : i32, i32
  }
  func.func @transform_4(%arg0: i32) -> (i32, i32) {
    %c0_i32 = arith.constant 0 : i32
    %c0_i32_0 = arith.constant 0 : i32
    %c0_i32_1 = arith.constant 0 : i32
    return %c0_i32, %c0_i32_0 : i32, i32
  }
  func.func @transform_5(%arg0: i32) -> (i32, i32) {
    %c0_i32 = arith.constant 0 : i32
    %c0_i32_0 = arith.constant 0 : i32
    return %arg0, %c0_i32 : i32, i32
  }
}

</mosaic_0001>

<bundles_post_ra>
// kernel: tpu_custom_call.1
= control target key start
LH: loop header
LB: loop body
LE: loop exit
PB: predicated region body
PF: predicated region fallthrough
CT: control target
= control target key end

     0   :  { %10 = vsyncpa [#allocation3], 0  ;;  %s1346_s0 = inlined_call_operand.hbm [shape: bf16[8,10,128], index: 0, kind: input, shape index: {}]   ;;  %s1347_s1 = inlined_call_operand.hbm [shape: bf16[384,128], index: 1, kind: input, shape index: {}]   ;;  %s1348_s2 = inlined_call_operand.hbm [shape: f32[1,128], index: 2, kind: input, shape index: {}]   ;;  %s1349_s3 = inlined_call_operand.hbm [shape: f32[128,128], index: 3, kind: input, shape index: {}]   ;;  %s1350_s4 = inlined_call_operand.hbm [shape: f32[1,128], index: 4, kind: input, shape index: {}]   ;;  %s1351_s5 = inlined_call_operand.hbm [shape: f32[8,128], index: 5, kind: output, shape index: {}]  }
   0x1   :  { %11 = vsyncpa [#allocation6], 0 }
   0x2   :  { %12 = vsyncpa [#allocation9], 0 }
   0x3   :  { %13 = vsyncpa [#allocation4], 0  ;;  %s1163_s18 = smov [#allocation5]   ;;  %s1164_s20 = smov [#allocation8]  }
   0x4   :  { %s31_s19 = sshll.u32 %s1163_s18, 4  ;;  %s53_s21 = sshll.u32 %s1164_s20, 4  ;;  %s32_s19 = int_to_ptr.vmem [resolvable:$true] %s31_s19  ;;  %s1206_s21 = int_to_ptr.vmem [resolvable:$true] %s53_s21 }
   0x5   :  { %s1023_s24 = scalar_lea.hbm %s1347_s1, 3072 }
   0x6   :  { %p1024_p0 = scmp.ne.s32.totalorder %s1347_s1, %s1023_s24  ;;  %p1027_p1 = scmp.lt.u32.totalorder %s1023_s24, %s1347_s1 }
   0x8   :  { %p1029_p2 = pnand %p1027_p1, %p1024_p0 }
   0xa   :  { %1032 = shalt.err (!%p1029_p2)
}
   0xb   :  { %s1033_s29 = scalar_lea.vmem %s32_s19, 3072  ;;  %p1038_p4 = scmp.lt.s32.totalorder %s32_s19, %s32_s19 }
   0xc   :  { %p1034_p3 = scmp.ne.s32.totalorder %s32_s19, %s1033_s29  ;;  %p1039_p5 = scmp.lt.s32.totalorder %s1033_s29, %s1033_s29 }
   0xe   :  { %p1040_p6 = por %p1039_p5, %p1038_p4 }
  0x10   :  { %p1041_p7 = pnand %p1040_p6, %p1034_p3 }
  0x12   :  { %1044 = shalt.err (!%p1041_p7)
}
  0x13   :  { %s1165_s30 = smov 64   ;;  %s1166_s6 = smov 4  }
  0x14   :  { %37 = dma.hbm_to_vmem [thread:$0]  %s1347_s1, 3072, %s32_s19, [#allocation6], %s1165_s30, %s1165_s30, %s1166_s6  }
  0x15   :  { %s1045_s11 = scalar_lea.hbm %s1349_s3, 2048 }
  0x16   :  { %p1046_p8 = scmp.ne.s32.totalorder %s1349_s3, %s1045_s11  ;;  %p1049_p9 = scmp.lt.u32.totalorder %s1045_s11, %s1349_s3 }
  0x18   :  { %p1051_p10 = pnand %p1049_p9, %p1046_p8 }
  0x1a   :  { %1054 = shalt.err (!%p1051_p10)
}
  0x1b   :  { %s1055_s16 = scalar_lea.vmem %s1206_s21, 2048  ;;  %p1060_p12 = scmp.lt.s32.totalorder %s1206_s21, %s1206_s21 }
  0x1c   :  { %p1056_p11 = scmp.ne.s32.totalorder %s1206_s21, %s1055_s16  ;;  %p1061_p13 = scmp.lt.s32.totalorder %s1055_s16, %s1055_s16 }
  0x1e   :  { %p1062_p0 = por %p1061_p13, %p1060_p12 }
  0x20   :  { %p1063_p1 = pnand %p1062_p0, %p1056_p11 }
  0x22   :  { %1066 = shalt.err (!%p1063_p1)
}
  0x23   :  { %s1167_s1 = smov 128   ;;  %s1168_s17 = smov 8  }
  0x24   :  { %59 = dma.hbm_to_vmem [thread:$0]  %s1349_s3, 2048, %s1206_s21, [#allocation9], %s1167_s1, %s1167_s1, %s1168_s17  }
  0x25   :  { %s1169_s20 = smov [#allocation2]   ;;  %s1170_s23 = smov [#allocation7]  }
  0x26   :  { %s19_s22 = sshll.u32 %s1169_s20, 4  ;;  %s44_s24 = sshll.u32 %s1170_s23, 4  ;;  %s20_s22 = int_to_ptr.vmem [resolvable:$true] %s19_s22  ;;  %s45_s24 = int_to_ptr.vmem [resolvable:$true] %s44_s24 }
  0x27   :  { %s1067_s27 = scalar_lea.hbm %s1346_s0, 1024 }
  0x28   :  { %p1068_p2 = scmp.ne.s32.totalorder %s1346_s0, %s1067_s27  ;;  %p1071_p3 = scmp.lt.u32.totalorder %s1067_s27, %s1346_s0 }
  0x2a   :  { %p1073_p4 = pnand %p1071_p3, %p1068_p2 }
  0x2c   :  { %1076 = shalt.err (!%p1073_p4)
}
  0x2d   :  { %s1077_s3 = scalar_lea.vmem %s20_s22, 1024  ;;  %p1082_p6 = scmp.lt.s32.totalorder %s20_s22, %s20_s22 }
  0x2e   :  { %p1078_p5 = scmp.ne.s32.totalorder %s20_s22, %s1077_s3  ;;  %p1083_p7 = scmp.lt.s32.totalorder %s1077_s3, %s1077_s3 }
  0x30   :  { %p1084_p8 = por %p1083_p7, %p1082_p6 }
  0x32   :  { %p1085_p9 = pnand %p1084_p8, %p1078_p5 }
  0x34   :  { %1088 = shalt.err (!%p1085_p9)
}
  0x35   :  { %25 = dma.hbm_to_vmem [thread:$0]  %s1346_s0, 1024, %s20_s22, [#allocation3], %s1165_s30, %s1165_s30, %s1166_s6  }
  0x36   :  { %s1089_s12 = scalar_lea.hbm %s1348_s2, 16 }
  0x37   :  { %p1090_p10 = scmp.ne.s32.totalorder %s1348_s2, %s1089_s12  ;;  %p1093_p11 = scmp.lt.u32.totalorder %s1089_s12, %s1348_s2 }
  0x39   :  { %p1095_p12 = pnand %p1093_p11, %p1090_p10 }
  0x3b   :  { %1098 = shalt.err (!%p1095_p12)
}
  0x3c   :  { %s1099_s1 = scalar_lea.vmem %s45_s24, 16  ;;  %s1103_s17 = scalar_lea.vmem %s45_s24, 32 }
  0x3d   :  { %p1100_p13 = scmp.ne.s32.totalorder %s45_s24, %s1099_s1  ;;  %p1104_p0 = scmp.lt.s32.totalorder %s45_s24, %s45_s24 }
  0x3e   :  { %p1105_p1 = scmp.lt.s32.totalorder %s1103_s17, %s1099_s1 }
  0x40   :  { %p1106_p2 = por %p1105_p1, %p1104_p0 }
  0x42   :  { %p1107_p3 = pnand %p1106_p2, %p1100_p13 }
  0x44   :  { %1110 = shalt.err (!%p1107_p3)
}
  0x45   :  { %47 = dma.hbm_to_vmem [thread:$0]  %s1348_s2, 16, %s45_s24, [#allocation6]  }
  0x46   :  { %s1171_s6 = smov [#allocation10]   ;;  %s1111_s22 = scalar_lea.hbm %s1350_s4, 16 }
  0x47   :  { %s66_s18 = sshll.u32 %s1171_s6, 4  ;;  %p1112_p4 = scmp.ne.s32.totalorder %s1350_s4, %s1111_s22  ;;  %s67_s18 = int_to_ptr.vmem [resolvable:$true] %s66_s18 }
  0x48   :  { %p1115_p5 = scmp.lt.u32.totalorder %s1111_s22, %s1350_s4 }
  0x4a   :  { %p1117_p6 = pnand %p1115_p5, %p1112_p4 }
  0x4c   :  { %1120 = shalt.err (!%p1117_p6)
}
  0x4d   :  { %s1121_s28 = scalar_lea.vmem %s67_s18, 16  ;;  %s1125_s2 = scalar_lea.vmem %s67_s18, 32 }
  0x4e   :  { %p1122_p7 = scmp.ne.s32.totalorder %s67_s18, %s1121_s28  ;;  %p1126_p8 = scmp.lt.s32.totalorder %s67_s18, %s67_s18 }
  0x4f   :  { %p1127_p9 = scmp.lt.s32.totalorder %s1125_s2, %s1121_s28 }
  0x51   :  { %p1128_p10 = por %p1127_p9, %p1126_p8 }
  0x53   :  { %p1129_p11 = pnand %p1128_p10, %p1122_p7 }
  0x55   :  { %1132 = shalt.err (!%p1129_p11)
}
  0x56   :  { %69 = dma.hbm_to_vmem [thread:$0]  %s1350_s4, 16, %s67_s18, [#allocation9]  }
  0x57   :  { %1155 = dma.done.wait [#allocation3], 1024  }
  0x58   :  { %1156 = vsyncadd [#allocation3], 4294966272 }
  0x59   :  { %1157 = dma.done.wait [#allocation6], 3088  }
  0x5a   :  { %1158 = vsyncadd [#allocation6], 4294964208 }
  0x5b   :  { %1159 = dma.done.wait [#allocation9], 2064  }
  0x5c   :  { %1160 = vsyncadd [#allocation9], 4294965232  ;;  %v987_v0 = vld [vmem:[#allocation5 + $0x40] sm:$0xff]   ;;  %v989_v2 = vld [vmem:[#allocation5 + $0x48] sm:$0xff]   ;;  %vm1173_vm0 = vmmov 0   ;;  %vm673_vm2 = vcmask 1041409  }
  0x5d   :  { %v988_v1 = vld [vmem:[#allocation5] sm:$0xff]   ;;  %822 = vmatprep.subr.bf16.mxu0 %v987_v0  ;;  %v991_v4 = vld [vmem:[#allocation5 + $0x8] sm:$0xff]   ;;  %v992_v5 = vld [vmem:[#allocation5 + $0x50] sm:$0xff]   ;;  %vm675_vm3 = vcmask 1042434   ;;  %vm677_vm4 = vcmask 1043459   ;;  %vm679_vm5 = vcmask 1044484  }
  0x5e   :  { %823 = vmatpush3.bf16.msra.mxu0 %v988_v1  ;;  %v990_v3 = vld [vmem:[#allocation5 + $0x80] sm:$0xff]   ;;  %v993_v6 = vld [vmem:[#allocation5 + $0x88] sm:$0xff]   ;;  %v994_v7 = vld [vmem:[#allocation5 + $0x10] sm:$0xff]   ;;  %vm681_vm6 = vcmask 1045509   ;;  %vm683_vm7 = vcmask 1046534   ;;  %vm685_vm8 = vcmask 1047559  }
  0x5f   :  { %824 = vmatprep.subr.bf16.mxu0 %v989_v2  ;;  %891 = vmatprep.subr.bf16.mxu1 %v990_v3  ;;  %v995_v8 = vld [vmem:[#allocation5 + $0x58] sm:$0xff]   ;;  %v996_v9 = vld [vmem:[#allocation5 + $0x90] sm:$0xff]   ;;  %v998_v11 = vld [vmem:[#allocation5 + $0x60] sm:$0xff]   ;;  %s1175_s4 = smov [#allocation11]  }
  0x60   :  { %892 = vmatpush3.bf16.msra.mxu1 %v990_v3  ;;  %v997_v10 = vld [vmem:[#allocation5 + $0x18] sm:$0xff]   ;;  %v1000_v13 = vld [vmem:[#allocation5 + $0x20] sm:$0xff]   ;;  %v1001_v15 = vld [vmem:[#allocation5 + $0x68] sm:$0xff]   ;;  %s765_s7 = sshll.u32 %s1175_s4, 4  ;;  %s766_s7 = int_to_ptr.vmem [resolvable:$true] %s765_s7 }
  0x61   :  { %893 = vmatprep.subr.bf16.mxu1 %v993_v6  ;;  %v999_v12 = vld [vmem:[#allocation5 + $0x98] sm:$0xff]   ;;  %v1002_v14 = vld [vmem:[#allocation5 + $0xa0] sm:$0xff]   ;;  %v1003_v16 = vld [vmem:[#allocation5 + $0x28] sm:$0xff]   ;;  %s1133_s8 = scalar_lea.vmem %s766_s7, 128  ;;  %p1138_p13 = scmp.lt.s32.totalorder %s766_s7, %s766_s7 }
  0x62   :  { %825 = vmatpush3.bf16.msra.mxu0 %v991_v4  ;;  %v1005_v17 = vld [vmem:[#allocation5 + $0xa8] sm:$0xff]   ;;  %v1004_v18 = vld [vmem:[#allocation5 + $0x70] sm:$0xff]   ;;  %v1007_v20 = vld [vmem:[#allocation5 + $0x78] sm:$0xff]   ;;  %p1134_p12 = scmp.ne.s32.totalorder %s766_s7, %s1133_s8  ;;  %p1139_p0 = scmp.lt.s32.totalorder %s1133_s8, %s1133_s8 }
  0x63   :  { %826 = vmatprep.subr.bf16.mxu0 %v992_v5  ;;  %v1006_v19 = vld [vmem:[#allocation5 + $0x30] sm:$0xff]   ;;  %v1279_v22 = vld [vmem:[#allocation2] sm:$0xf]  ;;  %v87_v23 = vld [vmem:[#allocation2 + $0x4] sm:$0x1] }
  0x64   :  { %894 = vmatpush3.bf16.msra.mxu1 %v993_v6  ;;  %v1008_v21 = vld [vmem:[#allocation5 + $0xb0] sm:$0xff]   ;;  %v1281_v24 = vld [vmem:[#allocation2 + $0x8] sm:$0xf]  ;;  %v89_v25 = vld [vmem:[#allocation2 + $0xc] sm:$0x1]  ;;  %v776_v26 = vcombine.low %v1279_v22, %v87_v23  ;;  %p1140_p1 = por %p1139_p0, %p1138_p13 }
  0x65   :  { %895 = vmatprep.subr.bf16.mxu1 %v996_v9  ;;  %v777_v27 = vcombine.low %v1281_v24, %v89_v25  ;;  %v1285_v28 = vld [vmem:[#allocation2 + $0x10] sm:$0xf]  ;;  %v91_v29 = vld [vmem:[#allocation2 + $0x14] sm:$0x1]  ;;  %v1009_v30 = vld [vmem:[#allocation5 + $0x38] sm:$0xff]   ;;  %v785_v62 = vcombine.low %v1279_v22, %v1281_v24 }
  0x66   :  { %827 = vmatpush3.bf16.msra.mxu0 %v994_v7  ;;  %v143_v31 = vshrl.u32 %v776_v26, 16  ;;  %v145_v32 = vshll.u32 %v776_v26, 16  ;;  %v198_v33 = vrot.slane %v776_v26, 1  ;;  %v1287_v34 = vld [vmem:[#allocation2 + $0x18] sm:$0xf]  ;;  %v778_v35 = vcombine.low %v1285_v28, %v91_v29  ;;  %p1141_p2 = pnand %p1140_p1, %p1134_p12 }
  0x67   :  { %828 = vmatprep.subr.bf16.mxu0 %v995_v8  ;;  %v150_v36 = vshrl.u32 %v777_v27, 16  ;;  %v152_v37 = vshll.u32 %v777_v27, 16  ;;  %v1013_v38 = vld [vmem:[#allocation5 + $0xb8] sm:$0xff]   ;;  %v199_v39 = vrot.slane %v777_v27, 1  ;;  %v1291_v45 = vld [vmem:[#allocation2 + $0x20] sm:$0xf]  ;;  %v788_v24 = vcombine.low %v1285_v28, %v1287_v34 }
  0x68   :  { %896 = vmatpush3.bf16.msra.mxu1 %v996_v9  ;;  %v93_v40 = vld [vmem:[#allocation2 + $0x1c] sm:$0x1]  ;;  %v147_v41 = vrot.slane %v145_v32, 1  ;;  %v200_v43 = vrot.slane %v778_v35, 1  ;;  %v157_v44 = vshrl.u32 %v778_v35, 16  ;;  %v159_v48 = vshll.u32 %v778_v35, 16 }
  0x69   :  { %897 = vmatprep.subr.bf16.mxu1 %v999_v12  ;;  %v779_v42 = vcombine.low %v1287_v34, %v93_v40  ;;  %v154_v46 = vrot.slane %v152_v37, 1  ;;  %v787_v47 = vcombine.low %v198_v33, %v199_v39  ;;  %v95_v49 = vld [vmem:[#allocation2 + $0x24] sm:$0x1]  ;;  %v96_v50 = vld [vmem:[#allocation2 + $0x28] sm:$0xf]  ;;  %v1172_v39 = vmov 0.0|0.0  }
  0x6a   :  { %829 = vmatpush3.bf16.msra.mxu0 %v997_v10  ;;  %v148_v51 = vor.u32 %v147_v41, %v143_v31  ;;  %v97_v55 = vld [vmem:[#allocation2 + $0x2c] sm:$0x1]  ;;  %v161_v57 = vrot.slane %v159_v48, 1  ;;  %v780_v58 = vcombine.low %v1291_v45, %v95_v49  ;;  %v98_v60 = vld [vmem:[#allocation2 + $0x30] sm:$0xf]  ;;  %v791_v35 = vcombine.low %v1291_v45, %v96_v50  ;;  %v645_v41 = vld [vmem:[#allocation8 + $0x18] sm:$0xff] }
  0x6b   :  { %830 = vmatprep.subr.bf16.mxu0 %v998_v11  ;;  %v201_v52 = vrot.slane %v779_v42, 1  ;;  %v164_v53 = vshrl.u32 %v779_v42, 16  ;;  %v166_v54 = vshll.u32 %v779_v42, 16  ;;  %v155_v56 = vor.u32 %v154_v46, %v150_v36  ;;  %v99_v61 = vld [vmem:[#allocation2 + $0x34] sm:$0x1]  ;;  %907 = vmatprep.mubr.bf16.mxu1 %v787_v47  ;;  %v643_v28 = vld [vmem:[#allocation8 + $0x8] sm:$0xff] }
  0x6c   :  { %898 = vmatpush3.bf16.msra.mxu1 %v999_v12  ;;  %v781_v59 = vcombine.low %v96_v50, %v97_v55  ;;  %v100_v1 = vld [vmem:[#allocation2 + $0x38] sm:$0xf]  ;;  %v101_v2 = vld [vmem:[#allocation2 + $0x3c] sm:$0x1]  ;;  %v782_v3 = vcombine.low %v98_v60, %v99_v61  ;;  %v162_v5 = vor.u32 %v161_v57, %v157_v44  ;;  %v171_v6 = vshrl.u32 %v780_v58, 16  ;;  %v647_v44 = vld [vmem:[#allocation8 + $0x28] sm:$0xff] }
  0x6d   :  { %899 = vmatprep.subr.bf16.mxu1 %v1002_v14  ;;  %v790_v63 = vcombine.low %v200_v43, %v201_v52  ;;  %v168_v0 = vrot.slane %v166_v54, 1  ;;  %v786_v4 = vcombine.low %v148_v51, %v155_v56  ;;  %v173_v7 = vshll.u32 %v780_v58, 16  ;;  %v644_v40 = vld [vmem:[#allocation8 + $0x10] sm:$0xff]  ;;  %v646_v43 = vld [vmem:[#allocation8 + $0x20] sm:$0xff]  ;;  %v649_v47 = vld [vmem:[#allocation8 + $0x38] sm:$0xff] }
  0x6e   :  { %831 = vmatpush3.bf16.msra.mxu0 %v1000_v13  ;;  %v178_v9 = vshrl.u32 %v781_v59, 16  ;;  %v180_v10 = vshll.u32 %v781_v59, 16  ;;  %v202_v11 = vrot.slane %v780_v58, 1  ;;  %v203_v13 = vrot.slane %v781_v59, 1  ;;  %v648_v46 = vld [vmem:[#allocation8 + $0x30] sm:$0xff]  ;;  %v650_v49 = vld [vmem:[#allocation8 + $0x40] sm:$0xff] }
  0x6f   :  { %832 = vmatprep.subr.bf16.mxu0 %v1001_v15  ;;  %v169_v8 = vor.u32 %v168_v0, %v164_v53  ;;  %477 = vmatprep.mubr.bf16.mxu0 %v786_v4  ;;  %v175_v12 = vrot.slane %v173_v7, 1  ;;  %v185_v25 = vshrl.u32 %v782_v3, 16  ;;  %v794_v37 = vcombine.low %v98_v60, %v100_v1  ;;  %v651_v50 = vld [vmem:[#allocation8 + $0x48] sm:$0xff]  ;;  %v652_v52 = vld [vmem:[#allocation8 + $0x50] sm:$0xff]  ;;  %v653_v53 = vld [vmem:[#allocation8 + $0x58] sm:$0xff] }
  0x70   :  { %900 = vmatpush3.bf16.msra.mxu1 %v1002_v14  ;;  %v783_v14 = vcombine.low %v100_v1, %v101_v2  ;;  %v954_v42 = vpack.c.bf16 %v645_v41, %v644_v40  ;;  %v957_v45 = vpack.c.bf16 %v647_v44, %v646_v43  ;;  %v960_v48 = vpack.c.bf16 %v649_v47, %v648_v46  ;;  %v654_v55 = vld [vmem:[#allocation8 + $0x60] sm:$0xff]  ;;  %v655_v56 = vld [vmem:[#allocation8 + $0x68] sm:$0xff]  ;;  %v656_v58 = vld [vmem:[#allocation8 + $0x70] sm:$0xff] }
  0x71   :  { %901 = vmatprep.subr.bf16.mxu1 %v1005_v17  ;;  %v789_v15 = vcombine.low %v162_v5, %v169_v8  ;;  %v963_v51 = vpack.c.bf16 %v651_v50, %v650_v49  ;;  %v966_v54 = vpack.c.bf16 %v653_v53, %v652_v52  ;;  %v969_v57 = vpack.c.bf16 %v655_v56, %v654_v55  ;;  %v657_v59 = vld [vmem:[#allocation8 + $0x78] sm:$0xff] }
  0x72   :  { %833 = vmatpush3.bf16.msra.mxu0 %v1003_v16  ;;  %v182_v16 = vrot.slane %v180_v10, 1  ;;  %v194_v23 = vshll.u32 %v783_v14, 16  ;;  %v192_v26 = vshrl.u32 %v783_v14, 16  ;;  %v972_v60 = vpack.c.bf16 %v657_v59, %v656_v58  ;;  %v1299_v2 = vld [vmem:[#allocation7] ss:$0 sm:$0xff] }
  0x73   :  { %834 = vmatprep.subr.bf16.mxu0 %v1004_v18  ;;  %v176_v18 = vor.u32 %v175_v12, %v171_v6  ;;  %v1174_v61 = vmov 0.0  }
  0x74   :  { %902 = vmatpush3.bf16.msra.mxu1 %v1005_v17  ;;  %v204_v17 = vrot.slane %v782_v3, 1  ;;  %v183_v22 = vor.u32 %v182_v16, %v178_v9  ;;  %v196_v31 = vrot.slane %v194_v23, 1 }
  0x75   :  { %903 = vmatprep.subr.bf16.mxu1 %v1008_v21 }
  0x76   :  { %835 = vmatpush3.bf16.msra.mxu0 %v1006_v19  ;;  %v793_v19 = vcombine.low %v202_v11, %v203_v13  ;;  %v792_v27 = vcombine.low %v176_v18, %v183_v22  ;;  %v197_v33 = vor.u32 %v196_v31, %v192_v26 }
  0x77   :  { %836 = vmatprep.subr.bf16.mxu0 %v1007_v20  ;;  %v205_v20 = vrot.slane %v783_v14, 1 }
  0x78   :  { %904 = vmatpush3.bf16.msra.mxu1 %v1008_v21  ;;  %v187_v21 = vshll.u32 %v782_v3, 16 }
  0x79   :  { %905 = vmatprep.subr.bf16.mxu1 %v1013_v38  ;;  %v796_v29 = vcombine.low %v204_v17, %v205_v20 }
  0x7a   :  { %837 = vmatpush3.bf16.msra.mxu0 %v1009_v30  ;;  %v189_v30 = vrot.slane %v187_v21, 1 }
  0x7b   :  { %950 = vmatprep.subr.bf16.mxu0 %v1172_v39 }
  0x7c   :  { %906 = vmatpush3.bf16.msra.mxu1 %v1013_v38  ;;  %v190_v32 = vor.u32 %v189_v30, %v185_v25  ;;  %v642_v38 = vld [vmem:[#allocation8] sm:$0xff] }
  0x7d   :  { %478 = vmatmul.mubr.bf16.vlgmr.msra.gmra.mrb[0].mxu0 %v785_v62  ;;  %v951_v34 = vpack.c.bf16 %v643_v28, %v642_v38  ;;  %v583_v62 = vlaneseq }
  0x7e   :  { %485 = vmatprep.mubr.bf16.mxu0 %v789_v15  ;;  %v795_v36 = vcombine.low %v190_v32, %v197_v33 }
  0x7f   :  { %908 = vmatmul.mubr.bf16.vlgmr.msra.gmra.mrb[0].mxu1 %v790_v63  ;;  %952 = vmatpush3.bf16.msra.mxu0 %v951_v34  ;;  %v1301_v7 = vshrl.u32 %v583_v62, 7 }
  0x80   :  { %911 = vmatprep.mubr.bf16.mxu1 %v793_v19  ;;  %953 = vmatprep.subr.bf16.mxu0 %v1172_v39 }
  0x81   :  { %vm585_vm1 = vcmp.lt.s32.totalorder %v1301_v7, 6 }
  0x83   :  { %955 = vmatpush3.bf16.msra.mxu0 %v954_v42 }
  0x84   :  { %956 = vmatprep.subr.bf16.mxu0 %v1172_v39 }
  0x85   :  { %486 = vmatmul.mubr.bf16.gmra.mrb[4].mxu0 %v788_v24 }
  0x86   :  { %493 = vmatprep.mubr.bf16.mxu0 %v792_v27 }
  0x87   :  { %912 = vmatmul.mubr.bf16.gmra.mrb[4].mxu1 %v796_v29  ;;  %958 = vmatpush3.bf16.msra.mxu0 %v957_v45 }
  0x88   :  { %959 = vmatprep.subr.bf16.mxu0 %v1172_v39 }
  0x8b   :  { %961 = vmatpush3.bf16.msra.mxu0 %v960_v48 }
  0x8c   :  { %962 = vmatprep.subr.bf16.mxu0 %v1172_v39 }
  0x8d   :  { %494 = vmatmul.mubr.bf16.gmra.mrb[8].mxu0 %v791_v35 }
  0x8e   :  { %501 = vmatprep.mubr.bf16.mxu0 %v795_v36 }
  0x8f   :  { %964 = vmatpush3.bf16.msra.mxu0 %v963_v51 }
  0x90   :  { %965 = vmatprep.subr.bf16.mxu0 %v1172_v39 }
  0x93   :  { %967 = vmatpush3.bf16.msra.mxu0 %v966_v54 }
  0x94   :  { %968 = vmatprep.subr.bf16.mxu0 %v1172_v39 }
  0x95   :  { %502 = vmatmul.mubr.bf16.gmra.mrb[12].mxu0 %v794_v37 }
  0x96   :  { %947 = vmatprep.mubr.msk.f32.mxu0 %vm1173_vm0, %v1174_v61 }
  0x97   :  { %970 = vmatpush3.bf16.msra.mxu0 %v969_v57 }
  0x98   :  { %971 = vmatprep.subr.bf16.mxu0 %v1172_v39 }
  0x9b   :  { %973 = vmatpush3.bf16.msra.mxu0 %v972_v60 }
 0x150   :  { %v838_v63 = vpop.f32.mrb[0].mxu0 }
 0x151   :  { %v839_v0 = vpop.f32.mrb[1].mxu0 }
 0x152   :  { %v909_v1 = vpop.f32.mrb[0].mxu1  ;;  %v840_v3 = vadd.f32 %v839_v0, %v838_v63  ;;  %v841_v4 = vpop.f32.mrb[2].mxu0 }
 0x153   :  { %v544_v5 = vpop.f32.mrb[1].mxu1  ;;  %v842_v6 = vpop.f32.mrb[3].mxu0 }
 0x154   :  { %v910_v8 = vpop.f32.mrb[2].mxu1  ;;  %v843_v9 = vadd.f32 %v842_v6, %v841_v4  ;;  %v480_v10 = vadd.f32 %v840_v3, %v1299_v2 }
 0x155   :  { %v547_v11 = vpop.f32.mrb[3].mxu1 }
 0x156   :  { %v545_v12 = vadd.f32 %v544_v5, %v480_v10  ;;  %v483_v13 = vadd.f32 %v843_v9, %v1299_v2 }
 0x158   :  { %v575_v14 = vmax.f32 %v545_v12, 0.0  ;;  %v548_v15 = vadd.f32 %v547_v11, %v483_v13  ;;  %v844_v16 = vpop.f32.mrb[4].mxu0 }
 0x159   :  { %v845_v17 = vpop.f32.mrb[5].mxu0 }
 0x15a   :  { %v1306_v18 = vpop.f32.mrb[4].mxu1  ;;  %v586_v19 = vsel %vm585_vm1, %v575_v14, 0.0  ;;  %v576_v20 = vmax.f32 %v548_v15, 0.0  ;;  %v846_v21 = vadd.f32 %v845_v17, %v844_v16  ;;  %v847_v22 = vpop.f32.mrb[6].mxu0 }
 0x15b   :  { %v560_v23 = vpop.f32.mrb[5].mxu1  ;;  %v594_v24 = vrot.slane %v586_v19, 4  ;;  %v848_v25 = vpop.f32.mrb[7].mxu0 }
 0x15c   :  { %v1310_v26 = vpop.f32.mrb[6].mxu1  ;;  %v587_v27 = vsel %vm585_vm1, %v576_v20, 0.0  ;;  %v488_v29 = vadd.f32 %v846_v21, %v1299_v2  ;;  %v849_v30 = vadd.f32 %v848_v25, %v847_v22 }
 0x15d   :  { %v563_v31 = vpop.f32.mrb[7].mxu1  ;;  %v595_v32 = vmax.f32 %v586_v19, %v594_v24  ;;  %v600_v33 = vrot.slane %v587_v27, 4 }
 0x15e   :  { %v553_v35 = vadd.f32 %v909_v1, %v488_v29  ;;  %v491_v36 = vadd.f32 %v849_v30, %v1299_v2 }
 0x15f   :  { %v596_v37 = vrot.slane %v595_v32, 2  ;;  %v601_v38 = vmax.f32 %v587_v27, %v600_v33 }
 0x160   :  { %v577_v28 = vmax.f32 %v553_v35, 0.0  ;;  %v556_v34 = vadd.f32 %v910_v8, %v491_v36  ;;  %v850_v39 = vpop.f32.mrb[8].mxu0 }
 0x161   :  { %v597_v40 = vmax.f32 %v595_v32, %v596_v37  ;;  %v602_v41 = vrot.slane %v601_v38, 2  ;;  %v851_v42 = vpop.f32.mrb[9].mxu0 }
 0x162   :  { %v588_v43 = vsel %vm585_vm1, %v577_v28, 0.0  ;;  %v578_v44 = vmax.f32 %v556_v34, 0.0  ;;  %v852_v45 = vadd.f32 %v851_v42, %v850_v39  ;;  %v853_v46 = vpop.f32.mrb[10].mxu0 }
 0x163   :  { %v598_v47 = vrot.slane %v597_v40, 1  ;;  %v603_v48 = vmax.f32 %v601_v38, %v602_v41  ;;  %v606_v49 = vrot.slane %v588_v43, 4  ;;  %v854_v50 = vpop.f32.mrb[11].mxu0 }
 0x164   :  { %v589_v51 = vsel %vm585_vm1, %v578_v44, 0.0  ;;  %v855_v52 = vadd.f32 %v854_v50, %v853_v46  ;;  %v496_v53 = vadd.f32 %v852_v45, %v1299_v2 }
 0x165   :  { %v604_v54 = vrot.slane %v603_v48, 1  ;;  %v607_v55 = vmax.f32 %v588_v43, %v606_v49  ;;  %v612_v56 = vrot.slane %v589_v51, 4  ;;  %v599_v59 = vmax.f32 %v597_v40, %v598_v47 }
 0x166   :  { %v561_v57 = vadd.f32 %v560_v23, %v496_v53  ;;  %v499_v58 = vadd.f32 %v855_v52, %v1299_v2 }
 0x167   :  { %v605_v60 = vmax.f32 %v603_v48, %v604_v54  ;;  %v608_v61 = vrot.slane %v607_v55, 2  ;;  %v613_v62 = vmax.f32 %v589_v51, %v612_v56  ;;  %v821_v56 = vld [vmem:[#allocation10] ss:$0 sm:$0xff] }
 0x168   :  { %v579_v63 = vmax.f32 %v561_v57, 0.0  ;;  %v564_v0 = vadd.f32 %v563_v31, %v499_v58  ;;  %v856_v1 = vpop.f32.mrb[12].mxu0 }
 0x169   :  { %v674_v3 = vsel %vm673_vm2, %v605_v60, %v599_v59  ;;  %v609_v4 = vmax.f32 %v607_v55, %v608_v61  ;;  %v614_v5 = vrot.slane %v613_v62, 2  ;;  %v857_v6 = vpop.f32.mrb[13].mxu0 }
 0x16a   :  { %v590_v8 = vsel %vm585_vm1, %v579_v63, 0.0  ;;  %v580_v9 = vmax.f32 %v564_v0, 0.0  ;;  %v858_v10 = vadd.f32 %v857_v6, %v856_v1  ;;  %v859_v11 = vpop.f32.mrb[14].mxu0 }
 0x16b   :  { %v610_v12 = vrot.slane %v609_v4, 1  ;;  %v615_v13 = vmax.f32 %v613_v62, %v614_v5  ;;  %v618_v14 = vrot.slane %v590_v8, 4  ;;  %v860_v15 = vpop.f32.mrb[15].mxu0 }
 0x16c   :  { %v591_v16 = vsel %vm585_vm1, %v580_v9, 0.0  ;;  %v504_v17 = vadd.f32 %v858_v10, %v1299_v2  ;;  %v861_v19 = vadd.f32 %v860_v15, %v859_v11 }
 0x16d   :  { %v611_v20 = vmax.f32 %v609_v4, %v610_v12  ;;  %v616_v21 = vrot.slane %v615_v13, 1  ;;  %v619_v22 = vmax.f32 %v590_v8, %v618_v14  ;;  %v624_v23 = vrot.slane %v591_v16, 4 }
 0x16e   :  { %v569_v24 = vadd.f32 %v1306_v18, %v504_v17  ;;  %v507_v25 = vadd.f32 %v861_v19, %v1299_v2 }
 0x16f   :  { %v676_v27 = vsel %vm675_vm3, %v611_v20, %v674_v3  ;;  %v617_v29 = vmax.f32 %v615_v13, %v616_v21  ;;  %v620_v30 = vrot.slane %v619_v22, 2  ;;  %v625_v31 = vmax.f32 %v591_v16, %v624_v23 }
 0x170   :  { %v581_v32 = vmax.f32 %v569_v24, 0.0  ;;  %v572_v33 = vadd.f32 %v1310_v26, %v507_v25 }
 0x171   :  { %v621_v35 = vmax.f32 %v619_v22, %v620_v30  ;;  %v626_v36 = vrot.slane %v625_v31, 2  ;;  %v678_v37 = vsel %vm677_vm4, %v617_v29, %v676_v27 }
 0x172   :  { %v592_v38 = vsel %vm585_vm1, %v581_v32, 0.0  ;;  %v582_v28 = vmax.f32 %v572_v33, 0.0 }
 0x173   :  { %v622_v34 = vrot.slane %v621_v35, 1  ;;  %v627_v39 = vmax.f32 %v625_v31, %v626_v36  ;;  %v630_v18 = vrot.slane %v592_v38, 4 }
 0x174   :  { %v593_v2 = vsel %vm585_vm1, %v582_v28, 0.0 }
 0x175   :  { %v623_v40 = vmax.f32 %v621_v35, %v622_v34  ;;  %v628_v41 = vrot.slane %v627_v39, 1  ;;  %v631_v42 = vmax.f32 %v592_v38, %v630_v18  ;;  %v636_v43 = vrot.slane %v593_v2, 4 }
 0x177   :  { %v629_v26 = vmax.f32 %v627_v39, %v628_v41  ;;  %v632_v44 = vrot.slane %v631_v42, 2  ;;  %v637_v45 = vmax.f32 %v593_v2, %v636_v43  ;;  %v680_v46 = vsel %vm679_vm5, %v623_v40, %v678_v37 }
 0x179   :  { %v633_v47 = vmax.f32 %v631_v42, %v632_v44  ;;  %v638_v48 = vrot.slane %v637_v45, 2  ;;  %v682_v49 = vsel %vm681_vm6, %v629_v26, %v680_v46 }
 0x17b   :  { %v634_v50 = vrot.slane %v633_v47, 1  ;;  %v639_v51 = vmax.f32 %v637_v45, %v638_v48 }
 0x17d   :  { %v635_v52 = vmax.f32 %v633_v47, %v634_v50  ;;  %v640_v53 = vrot.slane %v639_v51, 1 }
 0x17f   :  { %v641_v7 = vmax.f32 %v639_v51, %v640_v53  ;;  %v684_v54 = vsel %vm683_vm7, %v635_v52, %v682_v49 }
 0x181   :  { %v686_v55 = vsel %vm685_vm8, %v641_v7, %v684_v54 }
 0x182   :  { %948 = vmatmul.mubr.f32.vlgmr.msra.gmra.mrb[16].mxu0 %v686_v55 }
 0x255   :  { %v754_v57 = vpop.f32.mrb[16].mxu0 }
 0x256   :  { %v755_v58 = vadd.f32 %v821_v56, %v754_v57  ;;  %v949_v59 = vpop.f32.mrb[17].mxu0 }
 0x258   :  { %758 = vst [vmem:[#allocation11] sm:$0xff] %v755_v58 }
 0x259   :  { %1144 = shalt.err (!%p1141_p2)
}
 0x25a   :  { %s1145_s9 = scalar_lea.hbm %s1351_s5, 128 }
 0x25b   :  { %p1146_p3 = scmp.ne.s32.totalorder %s1351_s5, %s1145_s9  ;;  %p1149_p4 = scmp.lt.u32.totalorder %s1145_s9, %s1351_s5 }
 0x25d   :  { %p1151_p5 = pnand %p1149_p4, %p1146_p3 }
 0x25f   :  { %1154 = shalt.err (!%p1151_p5)
}
 0x260   :  { %768 = dma.vmem_to_hbm [thread:$0]  %s766_s7, 128, %s1351_s5, [#allocation4]  }
 0x261   :  { %1161 = dma.done.wait [#allocation4], 128  }
 0x262   :  { %1162 = vsyncadd [#allocation4], 4294967168 }
 0x263   :  { %772 = vsyncpa [#allocation3], 1 }
 0x264   :  { %773 = vsyncpa [#allocation6], 1 }
 0x265   :  { %774 = vsyncpa [#allocation9], 1 }
 0x266   :  { %775 = vsyncpa [#allocation4], 1 }

</bundles_post_ra>
